<compile_context>
chip_gen: v7x
topology: tpu7x:2x2x1
jax: 0.10.0
libtpu: 0.0.40
codegen_flags: <defaults>
</compile_context>

<pallas_src>
import functools
import math

import jax
import jax.numpy as jnp
from jax import lax
from jax.experimental import pallas as pl
from jax.experimental.pallas import tpu as pltpu


def _rup(x, m):
    """Round x up to a multiple of m."""
    return -(-x // m) * m


# ----------------------------------------------------------------------------
# Pallas kernel: im2col into VMEM scratch + one MXU matmul per row tile.
# ----------------------------------------------------------------------------
def _cross_embed_kernel(x_ref, w_ref, b_ref, o_ref, col_ref, *, kq, tr, wo, c2):
    # x_ref:   (1, Hq, Wq, C2)    space-to-depth'd padded input (one batch elem,
    #                             resident across all row tiles of that elem)
    # w_ref:   (kq*kq*C2, Dp)     im2col-flattened fused weights (Dp = Dout
    #                             padded to a multiple of 128)
    # b_ref:   (1, Dp)            concatenated (padded) bias, f32
    # o_ref:   (1, tr, Wo, Dp)    output row tile, lane-dense Dp
    # col_ref: (tr*Wo, kq*kq*C2)  VMEM im2col scratch (compute dtype)
    row0 = pl.multiple_of(pl.program_id(1) * tr, tr)

    # ---- im2col gather: one pass over the resident input per row tile. -----
    for qy in range(kq):
        for qx in range(kq):
            tap = qy * kq + qx
            patch = x_ref[0, pl.ds(row0 + qy, tr), qx:qx + wo, :]   # (tr, wo, c2)
            col_ref[:, tap * c2:(tap + 1) * c2] = (
                patch.reshape(tr * wo, c2).astype(col_ref.dtype))

    # ---- One MXU contraction over the full K = kq^2 * c2 (f32 accumulate). --
    acc = jnp.dot(col_ref[...], w_ref[...], preferred_element_type=jnp.float32)
    acc = acc + b_ref[...].astype(jnp.float32)          # (M, Dp) + (1, Dp)
    o_ref[0] = acc.reshape(tr, wo, o_ref.shape[-1]).astype(o_ref.dtype)


def _pick_row_tile(n, ho, wo, doutp, k_im2col, cdt_size, out_size,
                   *, budget_bytes=8 * 1024 * 1024, min_steps=8):
    """Largest divisor of ho whose per-tile VMEM footprint fits `budget_bytes`
    while keeping at least `min_steps` grid steps when possible (so both v7x
    TensorCores get work and DMAs overlap with compute)."""
    per_row = wo * (2 * doutp * out_size                    # double-buffered out tile
                    + _rup(k_im2col, 128) * cdt_size        # im2col scratch
                    + doutp * 4)                            # f32 matmul result staging
    divisors = [d for d in range(1, ho + 1) if ho % d == 0]
    fitting = [d for d in divisors if d * per_row <= budget_bytes] or [1]
    enough_steps = [d for d in fitting if n * (ho // d) >= min_steps]
    return max(enough_steps) if enough_steps else max(fitting)


def cross_embed_conv(xs, w_flat, bias, *, kq, ho, wo, out_dtype):
    """Fused multi-scale conv on a space-to-depth input.

    xs: (N, Hq, Wq, C2) with Hq = ho + kq - 1, Wq = wo + kq - 1.
    w_flat: (kq*kq*C2, Dp).  bias: (1, Dp) f32.  Returns (N, ho, wo, Dp).
    """
    n, hq, wq, c2 = xs.shape
    k_im2col, doutp = w_flat.shape
    assert k_im2col == kq * kq * c2
    assert ho % 8 == 0 and wo % 8 == 0 and doutp % 128 == 0

    cdt_size = jnp.dtype(xs.dtype).itemsize
    out_size = jnp.dtype(out_dtype).itemsize
    tr = _pick_row_tile(n, ho, wo, doutp, k_im2col, cdt_size, out_size)

    kernel = functools.partial(_cross_embed_kernel, kq=kq, tr=tr, wo=wo, c2=c2)

    # VMEM footprint with physical (8, 128) sublane/lane padding.
    x_blk = hq * _rup(wq, 8) * _rup(c2, 128) * cdt_size     # resident s2d image
    w_blk = _rup(k_im2col, 8) * doutp * cdt_size
    b_blk = 8 * doutp * 4
    o_blk = tr * wo * doutp * out_size
    col_blk = tr * wo * _rup(k_im2col, 128) * cdt_size
    acc_blk = tr * wo * doutp * 4
    est = 2 * (x_blk + w_blk + b_blk + o_blk) + col_blk + acc_blk
    # Keep below v7x's 64 MiB/TC when the footprint allows; never below need.
    # TODO(synk): for very large images on v7x, stream overlapping row windows
    # of xs via memory_space=pl.ANY + make_async_copy instead of full residency.
    vmem_limit = int(max(32 * 1024 * 1024,
                         min(int(1.5 * est), 56 * 1024 * 1024),
                         int(1.15 * est)))

    return pl.pallas_call(
        kernel,
        out_shape=jax.ShapeDtypeStruct((n, ho, wo, doutp), out_dtype),
        grid_spec=pltpu.PrefetchScalarGridSpec(
            num_scalar_prefetch=0,
            grid=(n, ho // tr),
            in_specs=[
                # Whole s2d image per batch element; block index independent of
                # the row-tile axis so it is DMA'd from HBM once per batch elem.
                pl.BlockSpec((1, hq, wq, c2), lambda b, r: (b, 0, 0, 0)),
                pl.BlockSpec((k_im2col, doutp), lambda b, r: (0, 0)),
                pl.BlockSpec((1, doutp), lambda b, r: (0, 0)),
            ],
            out_specs=pl.BlockSpec((1, tr, wo, doutp), lambda b, r: (b, r, 0, 0)),
            scratch_shapes=[pltpu.VMEM((tr * wo, k_im2col), xs.dtype)],
        ),
        compiler_params=pltpu.CompilerParams(
            dimension_semantics=("parallel", "parallel"),
            vmem_limit_bytes=vmem_limit,
        ),
    )(xs, w_flat, bias)


# ----------------------------------------------------------------------------
# CrossEmbedLayer: parameter setup + forward.
# ----------------------------------------------------------------------------
class CrossEmbedLayer:
    def __init__(self, key, dim_in, kernel_sizes, dim_out=None, stride=2,
                 compute_dtype=jnp.bfloat16):
        assert all(k % 2 == stride % 2 for k in kernel_sizes)
        dim_out = dim_out if dim_out is not None else dim_in
        kernel_sizes = sorted(kernel_sizes)
        num_scales = len(kernel_sizes)
        dim_scales = [int(dim_out / 2 ** i) for i in range(1, num_scales)]
        dim_scales = [*dim_scales, dim_out - sum(dim_scales)]

        self.stride = stride
        self.dim_in = dim_in
        self.dim_out = dim_out
        # bf16 operands by default (f32 accumulation on the MXU) — halves HBM /
        # VMEM traffic and uses the fast MXU path on v5e/v6e/v7x.
        self.compute_dtype = compute_dtype

        # Per-conv params (PyTorch nn.Conv2d-equivalent init); kept for reference.
        self.convs = []   # list of (kernel_size, padding, w_hwio, bias)
        for kernel, dim_scale in zip(kernel_sizes, dim_scales):
            key, kw, kb = jax.random.split(key, 3)
            fan_in = dim_in * kernel * kernel
            bound = 1.0 / math.sqrt(fan_in)   # matches nn.Conv2d default init
            w_oihw = jax.random.uniform(kw, (dim_scale, dim_in, kernel, kernel),
                                        jnp.float32, -bound, bound)
            b = jax.random.uniform(kb, (dim_scale,), jnp.float32, -bound, bound)
            w_hwio = jnp.transpose(w_oihw, (2, 3, 1, 0))
            padding = (kernel - stride) // 2
            self.convs.append((kernel, padding, w_hwio, b))

        # ---- Fuse all convs into one zero-embedded (kmax,kmax,Cin,Dout) conv. ---
        kmax = kernel_sizes[-1]
        pmax = (kmax - stride) // 2
        self.kmax, self.pmax = kmax, pmax
        W = jnp.zeros((kmax, kmax, dim_in, dim_out), jnp.float32)
        biases, off = [], 0
        for kernel, pad, w_hwio, b in self.convs:
            delta = pmax - pad                      # == (kmax - kernel) // 2
            c_i = w_hwio.shape[-1]
            # TODO(synk): skip the zero-embedded FLOPs by per-tap column
            # slicing (smallest-kernel group only touches the inner taps); the
            # zero columns currently ride on otherwise-idle MXU cycles.
            W = W.at[delta:delta + kernel, delta:delta + kernel, :,
                     off:off + c_i].set(w_hwio)
            biases.append(b)
            off += c_i
        B = jnp.concatenate(biases)

        # ---- Space-to-depth weight reorg + im2col flatten + Dout lane-pad. -----
        s = stride
        kq = -(-kmax // s)                          # ceil(kmax / stride)
        self.kq = kq
        self.c2 = s * s * dim_in
        self.doutp = _rup(dim_out, 128)             # lane-dense output channels
        Wp = jnp.pad(W, ((0, kq * s - kmax), (0, kq * s - kmax), (0, 0), (0, 0)))
        Wq = Wp.reshape(kq, s, kq, s, dim_in, dim_out)
        Wq = Wq.transpose(0, 2, 1, 3, 4, 5).reshape(kq, kq, self.c2, dim_out)
        w_flat = Wq.reshape(kq * kq * self.c2, dim_out)       # K-major = (qy,qx,c2)
        w_flat = jnp.pad(w_flat, ((0, 0), (0, self.doutp - dim_out)))
        self.w_flat = w_flat.astype(compute_dtype)
        self.bias = jnp.pad(B, (0, self.doutp - dim_out)).reshape(1, self.doutp)

    def __call__(self, x_nchw, channels_last=False):
        n, cin, h, w = x_nchw.shape
        s, kmax, pmax, kq = self.stride, self.kmax, self.pmax, self.kq
        ho = (h + 2 * pmax - kmax) // s + 1
        wo = (w + 2 * pmax - kmax) // s + 1
        # Pad the output grid to multiples of 8 so in-kernel reshapes are
        # layout-preserving and ho always has good row-tile divisors; padded
        # rows/cols are sliced off below (fused into the final transpose).
        ho_p, wo_p = _rup(ho, 8), _rup(wo, 8)
        hq, wq = ho_p + kq - 1, wo_p + kq - 1

        # NCHW -> NHWC, pad ONCE to the max padding, then space-to-depth by the
        # stride (all layout ops; XLA fuses them into one pass).
        x = jnp.transpose(x_nchw, (0, 2, 3, 1))
        pad_b = max(hq * s - (h + pmax), 0)
        pad_r = max(wq * s - (w + pmax), 0)
        x = jnp.pad(x, ((0, 0), (pmax, pad_b), (pmax, pad_r), (0, 0)))
        x = x[:, :hq * s, :wq * s, :]
        xs = (x.reshape(n, hq, s, wq, s, cin)
               .transpose(0, 1, 3, 2, 4, 5)
               .reshape(n, hq, wq, s * s * cin)
               .astype(self.compute_dtype))

        y = cross_embed_conv(xs, self.w_flat, self.bias,
                             kq=kq, ho=ho_p, wo=wo_p, out_dtype=x_nchw.dtype)
        y = y[:, :ho, :wo, :self.dim_out]
        if channels_last:
            return y            # skip the NHWC->NCHW HBM pass when allowed
        # The Ho/Wo/Dout de-padding slices fuse into this single transpose pass.
        return jnp.transpose(y, (0, 3, 1, 2))


# ----------------------------------------------------------------------------
# Reference (pure XLA) for verification.
# ----------------------------------------------------------------------------
def _reference_forward(layer, x_nchw):
    fmaps = []
    for (_, pad, w_hwio, b) in layer.convs:
        w_oihw = jnp.transpose(w_hwio, (3, 2, 0, 1))
        y = lax.conv_general_dilated(
            x_nchw, w_oihw,
            window_strides=(layer.stride, layer.stride),
            padding=((pad, pad), (pad, pad)),
            dimension_numbers=("NCHW", "OIHW", "NCHW"),
            precision=lax.Precision.HIGHEST,
        ) + b.reshape(1, -1, 1, 1)
        fmaps.append(y)
    return jnp.concatenate(fmaps, axis=1)


if __name__ == "__main__":
    key = jax.random.PRNGKey(0)
    k_params, k_x = jax.random.split(key)

    # Small shapes consistent with the module: batch=2, dim_in=4, H=W=16.
    dim_in, dim_out = 4, 8
    kernel_sizes = (2, 4)
    stride = 2
    x = jax.random.normal(k_x, (2, dim_in, 16, 16), jnp.float32)

    # Strict numerics check with f32 operands.
    layer_f32 = CrossEmbedLayer(k_params, dim_in, kernel_sizes,
                                dim_out=dim_out, stride=stride,
                                compute_dtype=jnp.float32)
    out = jax.block_until_ready(layer_f32(x))
    ref = jax.block_until_ready(_reference_forward(layer_f32, x))
    assert out.shape == (2, dim_out, 8, 8), out.shape
    assert jnp.allclose(out, ref, rtol=1e-4, atol=1e-4), \
        float(jnp.max(jnp.abs(out - ref)))

    # Default fast path: bf16 operands, f32 MXU accumulation (loose tolerance).
    layer_bf16 = CrossEmbedLayer(k_params, dim_in, kernel_sizes,
                                 dim_out=dim_out, stride=stride)
    out_bf16 = jax.block_until_ready(layer_bf16(x))
    assert out_bf16.shape == (2, dim_out, 8, 8), out_bf16.shape
    assert jnp.allclose(out_bf16, ref, rtol=1e-1, atol=1e-1), \
        float(jnp.max(jnp.abs(out_bf16 - ref)))

    print("KERNEL_OK")
</pallas_src>

<mosaic_0001>
module attributes {stable_mosaic.version = 11 : i64} {
  func.func @_cross_embed_kernel(%arg0: i32, %arg1: i32, %arg2: memref<1x9x9x16xf32, #tpu.memory_space<vmem>>, %arg3: memref<64x128xf32, #tpu.memory_space<vmem>>, %arg4: memref<1x128xf32, #tpu.memory_space<vmem>>, %arg5: memref<1x2x8x128xf32, #tpu.memory_space<vmem>>, %arg6: memref<16x64xf32, #tpu.memory_space<vmem>>) attributes {dimension_semantics = [#tpu.dimension_semantics<parallel>, #tpu.dimension_semantics<parallel>], iteration_bounds = array<i64: 2, 4>, scalar_prefetch = 0 : i64, scratch_operands = 1 : i64, tpu.core_type = #tpu.core_type<tc>, window_params = [{transform_indices = @transform_0, window_bounds = array<i64: 1, 9, 9, 16>}, {pipeline_mode = #tpu.pipeline_mode<synchronous>, transform_indices = @transform_1, window_bounds = array<i64: 64, 128>}, {pipeline_mode = #tpu.pipeline_mode<synchronous>, transform_indices = @transform_2, window_bounds = array<i64: 1, 128>}, {transform_indices = @transform_3, window_bounds = array<i64: 1, 2, 8, 128>}]} {
    %c2_i32 = arith.constant 2 : i32
    %0 = arith.muli %arg1, %c2_i32 : i32
    %1 = tpu.assume_multiple %0, 2 : i32
    %c0_i32 = arith.constant 0 : i32
    %2 = arith.addi %1, %c0_i32 : i32
    %c0 = arith.constant 0 : index
    %3 = arith.index_cast %2 : i32 to index
    %c0_0 = arith.constant 0 : index
    %c0_1 = arith.constant 0 : index
    %4 = vector.load %arg2[%c0, %3, %c0_0, %c0_1] : memref<1x9x9x16xf32, #tpu.memory_space<vmem>>, vector<1x2x8x16xf32>
    %5 = vector.shape_cast %4 : vector<1x2x8x16xf32> to vector<2x8x16xf32>
    %6 = vector.shape_cast %5 : vector<2x8x16xf32> to vector<16x16xf32>
    %c0_2 = arith.constant 0 : index
    %c0_3 = arith.constant 0 : index
    %7 = vector.load %arg6[%c0_2, %c0_3] : memref<16x64xf32, #tpu.memory_space<vmem>>, vector<16x16xf32>
    tpu.vector_store %arg6[%c0_2, %c0_3], %6 {strides = array<i32>} : memref<16x64xf32, #tpu.memory_space<vmem>>, vector<16x16xf32>,
    %c0_i32_4 = arith.constant 0 : i32
    %8 = arith.addi %1, %c0_i32_4 : i32
    %c0_5 = arith.constant 0 : index
    %9 = arith.index_cast %8 : i32 to index
    %c1 = arith.constant 1 : index
    %c0_6 = arith.constant 0 : index
    %10 = vector.load %arg2[%c0_5, %9, %c1, %c0_6] : memref<1x9x9x16xf32, #tpu.memory_space<vmem>>, vector<1x2x8x16xf32>
    %11 = vector.shape_cast %10 : vector<1x2x8x16xf32> to vector<2x8x16xf32>
    %12 = vector.shape_cast %11 : vector<2x8x16xf32> to vector<16x16xf32>
    %c0_7 = arith.constant 0 : index
    %c16 = arith.constant 16 : index
    %13 = vector.load %arg6[%c0_7, %c16] : memref<16x64xf32, #tpu.memory_space<vmem>>, vector<16x16xf32>
    tpu.vector_store %arg6[%c0_7, %c16], %12 {strides = array<i32>} : memref<16x64xf32, #tpu.memory_space<vmem>>, vector<16x16xf32>,
    %c1_i32 = arith.constant 1 : i32
    %14 = arith.addi %1, %c1_i32 : i32
    %c0_8 = arith.constant 0 : index
    %15 = arith.index_cast %14 : i32 to index
    %c0_9 = arith.constant 0 : index
    %c0_10 = arith.constant 0 : index
    %16 = vector.load %arg2[%c0_8, %15, %c0_9, %c0_10] : memref<1x9x9x16xf32, #tpu.memory_space<vmem>>, vector<1x2x8x16xf32>
    %17 = vector.shape_cast %16 : vector<1x2x8x16xf32> to vector<2x8x16xf32>
    %18 = vector.shape_cast %17 : vector<2x8x16xf32> to vector<16x16xf32>
    %c0_11 = arith.constant 0 : index
    %c32 = arith.constant 32 : index
    %19 = vector.load %arg6[%c0_11, %c32] : memref<16x64xf32, #tpu.memory_space<vmem>>, vector<16x16xf32>
    tpu.vector_store %arg6[%c0_11, %c32], %18 {strides = array<i32>} : memref<16x64xf32, #tpu.memory_space<vmem>>, vector<16x16xf32>,
    %c1_i32_12 = arith.constant 1 : i32
    %20 = arith.addi %1, %c1_i32_12 : i32
    %c0_13 = arith.constant 0 : index
    %21 = arith.index_cast %20 : i32 to index
    %c1_14 = arith.constant 1 : index
    %c0_15 = arith.constant 0 : index
    %22 = vector.load %arg2[%c0_13, %21, %c1_14, %c0_15] : memref<1x9x9x16xf32, #tpu.memory_space<vmem>>, vector<1x2x8x16xf32>
    %23 = vector.shape_cast %22 : vector<1x2x8x16xf32> to vector<2x8x16xf32>
    %24 = vector.shape_cast %23 : vector<2x8x16xf32> to vector<16x16xf32>
    %c0_16 = arith.constant 0 : index
    %c48 = arith.constant 48 : index
    %25 = vector.load %arg6[%c0_16, %c48] : memref<16x64xf32, #tpu.memory_space<vmem>>, vector<16x16xf32>
    tpu.vector_store %arg6[%c0_16, %c48], %24 {strides = array<i32>} : memref<16x64xf32, #tpu.memory_space<vmem>>, vector<16x16xf32>,
    %c0_17 = arith.constant 0 : index
    %c0_18 = arith.constant 0 : index
    %26 = vector.load %arg6[%c0_17, %c0_18] : memref<16x64xf32, #tpu.memory_space<vmem>>, vector<16x64xf32>
    %c0_19 = arith.constant 0 : index
    %c0_20 = arith.constant 0 : index
    %27 = vector.load %arg3[%c0_19, %c0_20] : memref<64x128xf32, #tpu.memory_space<vmem>>, vector<64x128xf32>
    %cst = arith.constant dense<0.000000e+00> : vector<16x128xf32>
    %28 = tpu.matmul %26, %27, %cst {dimension_numbers = #tpu.dot_dimension_numbers<[1], [0], [0], [1], [0, 0, 1, 1], [], []>} : vector<16x64xf32>, vector<64x128xf32>, vector<16x128xf32> -> vector<16x128xf32>
    %c0_21 = arith.constant 0 : index
    %c0_22 = arith.constant 0 : index
    %29 = vector.load %arg4[%c0_21, %c0_22] : memref<1x128xf32, #tpu.memory_space<vmem>>, vector<1x128xf32>
    %30 = vector.broadcast %29 : vector<1x128xf32> to vector<16x128xf32>
    %31 = arith.addf %28, %30 : vector<16x128xf32>
    %32 = vector.shape_cast %31 : vector<16x128xf32> to vector<2x8x128xf32>
    %c0_23 = arith.constant 0 : index
    %c0_24 = arith.constant 0 : index
    %c0_25 = arith.constant 0 : index
    %c0_26 = arith.constant 0 : index
    %33 = vector.load %arg5[%c0_23, %c0_24, %c0_25, %c0_26] : memref<1x2x8x128xf32, #tpu.memory_space<vmem>>, vector<1x2x8x128xf32>
    %34 = vector.shape_cast %33 : vector<1x2x8x128xf32> to vector<2x8x128xf32>
    %35 = vector.shape_cast %32 : vector<2x8x128xf32> to vector<1x2x8x128xf32>
    tpu.vector_store %arg5[%c0_23, %c0_24, %c0_25, %c0_26], %35 {strides = array<i32>} : memref<1x2x8x128xf32, #tpu.memory_space<vmem>>, vector<1x2x8x128xf32>,
    return
  }
  func.func @transform_0(%arg0: i32, %arg1: i32) -> (i32, i32, i32, i32) {
    %c0_i32 = arith.constant 0 : i32
    %c0_i32_0 = arith.constant 0 : i32
    %c0_i32_1 = arith.constant 0 : i32
    %c0_i32_2 = arith.constant 0 : i32
    return %arg0, %c0_i32, %c0_i32_0, %c0_i32_1 : i32, i32, i32, i32
  }
  func.func @transform_1(%arg0: i32, %arg1: i32) -> (i32, i32) {
    %c0_i32 = arith.constant 0 : i32
    %c0_i32_0 = arith.constant 0 : i32
    %c0_i32_1 = arith.constant 0 : i32
    return %c0_i32, %c0_i32_0 : i32, i32
  }
  func.func @transform_2(%arg0: i32, %arg1: i32) -> (i32, i32) {
    %c0_i32 = arith.constant 0 : i32
    %c0_i32_0 = arith.constant 0 : i32
    %c0_i32_1 = arith.constant 0 : i32
    return %c0_i32, %c0_i32_0 : i32, i32
  }
  func.func @transform_3(%arg0: i32, %arg1: i32) -> (i32, i32, i32, i32) {
    %c0_i32 = arith.constant 0 : i32
    %c0_i32_0 = arith.constant 0 : i32
    %c0_i32_1 = arith.constant 0 : i32
    return %arg0, %arg1, %c0_i32, %c0_i32_0 : i32, i32, i32, i32
  }
}

</mosaic_0001>

<bundles_post_ra>
// kernel: tpu_custom_call.1
= control target key start
LH: loop header
LB: loop body
LE: loop exit
PB: predicated region body
PF: predicated region fallthrough
CT: control target
= control target key end

     0   :  { %8 = vsyncpa [#allocation4], 0  ;;  %s869_s0 = inlined_call_operand.vmem [shape: f32[2,9,9,16], index: 0, kind: input, shape index: {}]   ;;  %s870_s1 = inlined_call_operand.vmem [shape: f32[64,128], index: 1, kind: input, shape index: {}]   ;;  %s871_s2 = inlined_call_operand.vmem [shape: f32[1,128], index: 2, kind: input, shape index: {}]   ;;  %s872_s3 = inlined_call_operand.hbm [shape: f32[2,8,8,128], index: 3, kind: output, shape index: {}]  }
   0x1   :  { %10 = vsyncpa [#allocation4 + $0x1], 0  ;;  %s703_s12 = smov 0   ;;  %s705_s13 = smov 0  }
   0x2   :  { %s707_s14 = smov 0   ;;  %s709_s15 = smov 0  }
   0x3   :  { %s711_s16 = smov 0   ;;  %s713_s17 = smov 0  }
   0x4   :  { %s715_s18 = smov 0   ;;  %s717_s19 = smov 0  }
   0x5 LB: > { %s433_s20 = sadd.s32 4294967295, %s675_s19   ;;  %s434_s21 = sadd.s32 4294967294, %s675_s19   ;;  %s675_s19 = sphi %s717_s19, %s16_s19   ;;  %s671_s18 = sphi %s715_s18, %s881_s18   ;;  %s667_s17 = sphi %s713_s17, %s880_s17   ;;  %s663_s16 = sphi %s711_s16, %s879_s16   ;;  %s659_s15 = sphi %s709_s15, %s878_s15   ;;  %s655_s14 = sphi %s707_s14, %s877_s14   ;;  %s651_s13 = sphi %s705_s13, %s876_s13   ;;  %s647_s12 = sphi %s703_s12, %s875_s12  }
   0x6   : > { %s25_s22 = sadd.s32 1, %s667_s17  ;;  %s28_s23 = sadd.s32 1, %s671_s18 }
   0x7   : > { %p26_p0 = scmp.ge.s32.totalorder %s25_s22, 4  ;;  %p115_p1 = scmp.ne.s32.totalorder %s655_s14, %s651_s13 }
   0x8   : > { %p116_p2 = scmp.eq.s32.totalorder %s433_s20, 7  ;;  %p121_p5 = scmp.ne.s32.totalorder %s651_s13, %s647_s12 }
   0x9   : > { %s883_s22 = smov (%p26_p0, %s25_s22), 0  ;;  %s885_s23 = smov (!%p26_p0, %s28_s23), %s671_s18 }
   0xa   : > { %s101_s24 = ssub.s32 %s667_s17, %s883_s22  ;;  %p754_p3 = por %p116_p2, %p115_p1 }
   0xb   : > { %p30_p4 = scmp.ge.s32.totalorder %s885_s23, 2  ;;  %p122_p6 = scmp.eq.s32.totalorder %s434_s21, 7 }
   0xc   : > { %p437_p7 = scmp.ge.s32.totalorder %s675_s19, 1  ;;  %p154_p9 = scmp.lt.s32.totalorder %s675_s19, 9 }
   0xd   : > { %s887_s23 = smov (%p30_p4, %s885_s23), 0  ;;  %p763_p8 = por %p122_p6, %p121_p5 }
   0xe   : > { %s100_s27 = ssub.s32 %s671_s18, %s887_s23  ;;  %s105_s28 = sadd.s32 1, %s655_s14 }
   0xf   : > { %s102_s29 = sor.u32 %s101_s24, %s100_s27  ;;  %p155_p10 = pnand %p437_p7, %p154_p9 }
  0x10   : > { %p103_p11 = scmp.eq.s32.totalorder %s102_s29, 0  ;;  %p178_p12 = scmp.lt.s32.totalorder (!%p155_p10), %s663_s16, 1  ;;  %v236_v0 = vld [vmem:[%s870_s1] sm:$0xff] (!%p155_p10)  ;;  %v237_v1 = vld [vmem:[%s870_s1 + $0x8] sm:$0xff] (!%p155_p10)  ;;  %v238_v2 = vld [vmem:[%s870_s1 + $0x10] sm:$0xff] (!%p155_p10)  ;;  %vm189_vm0 = vcmask (!%p155_p10), 130048  }
  0x11   : > { %158 = sbr.rel (%p155_p10) target bundleno = 393 (0x189), region = 32  ;;  %v239_v3 = vld [vmem:[%s870_s1 + $0x18] sm:$0xff] (!%p155_p10)  ;;  %v488_v4 = vpack.c.bf16 (!%p155_p10), %v237_v1, %v236_v0  ;;  %s457_s24 = sshll.u32 (!%p155_p10), %s659_s15, 5  ;;  %v240_v6 = vld [vmem:[%s870_s1 + $0x20] sm:$0xff] (!%p155_p10)  ;;  %v241_v7 = vld [vmem:[%s870_s1 + $0x28] sm:$0xff] (!%p155_p10)  ;;  %vm202_vm1 = vcmask (!%p155_p10), 261248  }
  0x12   : > { %s772_s30 = scalar_select %p103_p11, %s655_s14, %s105_s28  }
  0x13   : > { %v492_v5 = vpack.c.bf16 (!%p155_p10), %v239_v3, %v238_v2  ;;  %489 = vmatprep.subr.bf16.mxu0 (!%p155_p10), %v488_v4  ;;  %v496_v8 = vpack.c.bf16 (!%p155_p10), %v241_v7, %v240_v6  ;;  %v242_v9 = vld [vmem:[%s870_s1 + $0x30] sm:$0xff] (!%p155_p10)  ;;  %v243_v12 = vld [vmem:[%s870_s1 + $0x38] sm:$0xff] (!%p155_p10)  ;;  %s677_s27 = smov (!%p155_p10), 16   ;;  %s678_s28 = smov (!%p155_p10), 32   ;;  %vm218_vm2 = vcmask (!%p155_p10), 392448   ;;  %vm231_vm3 = vcmask (!%p155_p10), 523648  }
  0x14   : > { %491 = vmatpush3.bf16.msra.mxu0 (!%p155_p10), %v488_v4  ;;  %v500_v16 = vpack.c.bf16 (!%p155_p10), %v243_v12, %v242_v9  ;;  %vm251_vm4 = vcmask (!%p155_p10), 523264   ;;  %s452_s4 = sshll.u32 (!%p155_p10), %s659_s15, 1  ;;  %s453_s5 = sshll.u32 (!%p155_p10), %s663_s16, 3  ;;  %v448_v26 = vld [vmem:[%s871_s2] ss:$0 sm:$0xff] (!%p155_p10) }
  0x15   : > { %493 = vmatprep.subr.bf16.mxu0 (!%p155_p10), %v492_v5  ;;  %s348_s6 = sadd.s32 (!%p155_p10), %s453_s5, %s452_s4 }
  0x16   : > { %s454_s11 = sshll.u32 (!%p155_p10), %s348_s6, 7 }
  0x18   : > { %s179_s20 = scalar_select %p178_p12, %s663_s16, 1  ;;  %495 = vmatpush3.bf16.msra.mxu0 %v492_v5 }
  0x19   : > { %497 = vmatprep.subr.bf16.mxu0 %v496_v8  ;;  %s815_s16 = scalar_lea.hbm %s872_s3, %s454_s11 }
  0x1a   : > { %s504_s21 = smul.u32 144, %s179_s20 }
  0x1c   : > { %s182_s7 = scalar_lea.vmem %s869_s0, %s504_s21  ;;  %499 = vmatpush3.bf16.msra.mxu0 %v496_v8  ;;  %s679_s21 = smov 48  }
  0x1d   : > { %s186_s8 = scalar_lea.vmem %s182_s7, %s457_s24  ;;  %501 = vmatprep.subr.bf16.mxu0 %v500_v16  ;;  %s175_s24 = sand.u32 1, %s651_s13  }
  0x1e   : > { %v192_v10 = vld [vmem:[%s186_s8 + $0x1] sm:$0xff]  ;;  %v444_v11 = vld [vmem:[%s186_s8 + $0x10] sm:$0xff]  ;;  %s438_s29 = sshll.u32 %s175_s24, 4 }
  0x1f   : > { %196 = vrot.lane.b32.xlu0 %v192_v10, %s677_s27  ;;  %212 = vrot.lane.b32.xlu1 %v444_v11, %s678_s28  ;;  %191 = vst.msk [vmem:[#allocation2 + $0x8] sm:$0xff] %vm189_vm0, %v444_v11  ;;  %v193_v13 = vld [vmem:[%s186_s8 + $0x11] sm:$0xff]  ;;  %v445_v14 = vld [vmem:[%s186_s8 + $0x20] sm:$0xff]  ;;  %s177_s9 = scalar_lea.vmem [#allocation3], %s438_s29 }
  0x20   : > { %v187_v15 = vld [vmem:[%s186_s8] sm:$0xff]  ;;  %503 = vmatpush3.bf16.msra.mxu0 %v500_v16  ;;  %s351_s10 = sshll.u32 %s177_s9, 4  ;;  %s810_s10 = int_to_ptr.vmem [resolvable:$true] %s351_s10 }
  0x21   : > { %190 = vst.msk [vmem:[#allocation2] sm:$0xff] %vm189_vm0, %v187_v15  ;;  %v447_v17 = vld [vmem:[%s186_s8 + $0x21] sm:$0xff] }
  0x23   : > { %198 = vrot.lane.b32.xlu0 %v193_v13, %s677_s27  ;;  %214 = vrot.lane.b32.xlu1 %v445_v14, %s678_s28  ;;  %s817_s27 = scalar_lea.sflag [#allocation4], %s175_s24  ;;  %s581_s28 = scalar_lea.vmem %s810_s10, 256 }
  0x24   : > { %p582_p13 = scmp.ne.s32.totalorder %s810_s10, %s581_s28 }
  0x26   : > { %p583_p0 = pnand %p582_p13, %p754_p3 }
  0x27   : > { %225 = vrot.lane.b32.xlu0 %v193_v13, %s679_s21  ;;  %227 = vrot.lane.b32.xlu1 %v447_v17, %s679_s21  ;;  %s680_s21 = smov [#allocation3]  }
  0x28   : > { %p584_p1 = pneg %p583_p0  ;;  %s585_s29 = sshll.u32 %s680_s21, 4  ;;  %s586_s29 = int_to_ptr.vmem [resolvable:$false] %s585_s29 }
  0x29   : > { %s587_s4 = scalar_lea.vmem %s586_s29, 512  ;;  %p588_p2 = scmp.lt.s32.totalorder %s810_s10, %s586_s29 }
  0x2a   : > { %p589_p4 = scmp.lt.s32.totalorder %s587_s4, %s581_s28 }
  0x2c   : > { %p590_p5 = por %p589_p4, %p588_p2 }
  0x2e   : > { %p591_p6 = pnand %p590_p5, %p584_p1 }
  0x91   : > { %v197_v18 = vpop.permute.xlu0 %196  ;;  %v213_v19 = vpop.permute.xlu1 %212 }
  0x92   : > { %203 = vst.msk [vmem:[#allocation2] sm:$0xff] %vm202_vm1, %v197_v18 }
  0x93   : > { %219 = vst.msk [vmem:[#allocation2] sm:$0xff] %vm218_vm2, %v213_v19 }
  0x95   : > { %v199_v20 = vpop.permute.xlu0 %198  ;;  %v215_v21 = vpop.permute.xlu1 %214 }
  0x96   : > { %204 = vst.msk [vmem:[#allocation2 + $0x8] sm:$0xff] %vm202_vm1, %v199_v20 }
  0x97   : > { %220 = vst.msk [vmem:[#allocation2 + $0x8] sm:$0xff] %vm218_vm2, %v215_v21 }
  0x99   : > { %v226_v22 = vpop.permute.xlu0 %225  ;;  %v228_v23 = vpop.permute.xlu1 %227 }
  0x9a   : > { %232 = vst.msk [vmem:[#allocation2] sm:$0xff] %vm231_vm3, %v226_v22  ;;  %233 = vst.msk [vmem:[#allocation2 + $0x8] sm:$0xff] %vm231_vm3, %v228_v23 }
  0xa1   : > { %v234_v24 = vld [vmem:[#allocation2] sm:$0xff]  ;;  %v235_v25 = vld [vmem:[#allocation2 + $0x8] sm:$0xff] }
  0xa2   : > { %485 = vmatprep.mubr.msk.f32.mxu0 %vm251_vm4, %v234_v24 }
  0xa3   : > { %486 = vmatmul.mubr.msk.f32.vlgmr.msra.gmra.mrb[0].mxu0 %vm251_vm4, %v235_v25 }
 0x176   : > { %v487_v27 = vpop.f32.mrb[0].mxu0 }
 0x177   : > { %v330_v28 = vadd.f32 %v487_v27, %v448_v26  ;;  %v324_v29 = vpop.f32.mrb[1].mxu0 }
 0x178   : > { %v325_v30 = vadd.f32 %v448_v26, %v324_v29 }
 0x179   : > { %334 = vst [vmem:[%s177_s9 + $0x8] sm:$0xff] %v330_v28 }
 0x17a   : > { %333 = vst [vmem:[%s177_s9] sm:$0xff] %v325_v30 }
 0x17b   : > { %594 = shalt.err (!%p591_p6)
}
 0x17c   : > { %s595_s24 = scalar_lea.hbm %s815_s16, 256  ;;  %s599_s7 = scalar_lea.hbm %s872_s3, 2048 }
 0x17d   : > { %p596_p7 = scmp.ne.s32.totalorder %s815_s16, %s595_s24  ;;  %p600_p11 = scmp.lt.u32.totalorder %s815_s16, %s872_s3 }
 0x17e   : > { %p601_p12 = scmp.lt.u32.totalorder %s599_s7, %s595_s24  ;;  %p603_p0 = scmp.lt.u32.totalorder %s595_s24, %s815_s16 }
 0x17f   : > { %p597_p9 = pnand %p596_p7, %p754_p3 }
 0x180   : > { %p602_p13 = por %p601_p12, %p600_p11 }
 0x181   : > { %p598_p10 = pneg %p597_p9 }
 0x182   : > { %p604_p1 = por %p603_p0, %p602_p13 }
 0x184   : > { %p605_p2 = pnand %p604_p1, %p598_p10 }
 0x186   : > { %608 = shalt.err (!%p605_p2)
}
 0x187   : > { %s681_s11 = smov 128   ;;  %s682_s20 = smov 8  }
 0x188   : > { %505 = dma.vmem_to_hbm [thread:$0]  (%p754_p3), %s810_s10, 256, %s815_s16, %s817_s27, %s681_s11, %s681_s11, %s682_s20  }
 0x189 PF: > { %p511_p4 = scmp.ge.s32.totalorder %s675_s19, 2  ;;  %s366_s15 = sand.u32 1, %s647_s12  }
 0x18a   : > { %s367_s28 = scalar_lea.sflag [#allocation4], %s366_s15 }
 0x18b   : > { %p508_p5 = pnand %p511_p4, %p763_p8 }
 0x18d   : > { %642 = dma.done.wait (!%p508_p5), %s367_s28, 256  }
 0x18e   : > { %644 = vsyncadd (!%p508_p5), %s367_s28, 4294967040  ;;  %s16_s19 = sadd.s32 1, %s675_s19   ;;  %s875_s12 = smov %s651_s13 }
 0x18f   : > { %p13_p6 = scmp.ge.s32.totalorder %s16_s19, 10   ;;  %s876_s13 = smov %s655_s14 }
 0x190   : > { %s877_s14 = smov %s772_s30  ;;  %s878_s15 = smov %s667_s17 }
 0x191   : > { %s879_s16 = smov %s671_s18  ;;  %s880_s17 = smov %s883_s22 }
 0x192   : > { %s881_s18 = smov %s887_s23  ;;  %15 = sbr.rel (!%p13_p6) target bundleno = 5 (0x5), region = 69 }
 0x199   :  { %372 = vsyncpa [#allocation4], 1 }
 0x19a   :  { %374 = vsyncpa [#allocation4 + $0x1], 1 }

</bundles_post_ra>
